<compile_context>
chip_gen: v5e
topology: v5e:2x2
jax: 0.10.0
libtpu: 0.0.40
codegen_flags: <defaults>
</compile_context>

<pallas_src>
import jax
import jax.numpy as jnp
from jax.experimental import pallas as pl
from jax.experimental.pallas import tpu as pltpu


def _round_up(n, m):
    return ((n + m - 1) // m) * m


def _adapter_kernel(x_ref, wd_ref, bd_ref, wu_ref, bu_ref, o_ref):
    """One row tile: out = relu(x @ Wd^T + bd) @ Wu^T + bu + x."""
    x = x_ref[...]                                   # (tm, D), input dtype
    cdt = wd_ref.dtype                               # matmul operand dtype (bf16 default)
    # Down projection (MXU, f32 accumulation) + bias + ReLU.
    h = jnp.dot(x.astype(cdt), wd_ref[...], preferred_element_type=jnp.float32)
    h = jnp.maximum(h + bd_ref[...], 0.0)            # (tm, Bp), f32
    # Up projection + bias.
    out = jnp.dot(h.astype(cdt), wu_ref[...], preferred_element_type=jnp.float32)
    out = out + bu_ref[...]                          # (tm, D), f32
    # Residual add + final cast fused into the kernel epilogue (no extra
    # XLA pass over the output, no explicit f32 upcast of x).
    o_ref[...] = out.astype(o_ref.dtype) + x


def prepare_adapter_params(w_down, b_down, w_up, b_up,
                           compute_dtype=jnp.bfloat16):
    """Transpose, bottleneck-pad and cast the adapter weights once.

    w_down: (bottleneck, input_dim)   (PyTorch nn.Linear layout)
    b_down: (bottleneck,)
    w_up:   (opt_dim, bottleneck)
    b_up:   (opt_dim,)
    """
    B, D = w_down.shape
    Dout = w_up.shape[0]
    Bp = _round_up(B, 128)
    wd_t = jnp.pad(w_down.T.astype(compute_dtype), ((0, 0), (0, Bp - B)))  # (D, Bp)
    wu_t = jnp.pad(w_up.T.astype(compute_dtype), ((0, Bp - B), (0, 0)))    # (Bp, Dout)
    bd2 = jnp.pad(b_down.astype(jnp.float32), (0, Bp - B)).reshape(1, Bp)
    bu2 = b_up.astype(jnp.float32).reshape(1, Dout)
    return wd_t, bd2, wu_t, bu2


def adapter_forward_prepared(x, wd_t, bd2, wu_t, bu2, *, tm=None,
                             vmem_limit_bytes=None):
    """Adapter forward using pre-transposed/padded weights (see above)."""
    orig_shape = x.shape
    dtype = x.dtype
    D = orig_shape[-1]
    Bp = wd_t.shape[1]
    itemsize = jnp.dtype(dtype).itemsize
    w_itemsize = jnp.dtype(wd_t.dtype).itemsize

    x2 = x.reshape(-1, D)                            # (M, D)
    M = x2.shape[0]

    # --- VMEM budget: leave ~25% headroom below physical capacity
    #     (v7x: 64 MiB -> 48 MiB; v5e/v6e: 128 MiB -> capped at ~96 MiB).
    if vmem_limit_bytes is None:
        try:
            phys = pltpu.get_tpu_info().vmem_capacity_bytes
        except Exception:
            phys = 64 * 1024 * 1024
        vmem_limit_bytes = int(min(phys * 3 // 4, 100 * 1024 * 1024))

    # --- Row tile: biggest tile whose double-buffered in/out activations plus
    #     resident (double-buffered) weights and the f32 intermediates fit the
    #     budget, capped so there are >= ~4 grid steps (megacore + overlap).
    if tm is None:
        weight_bytes = (wd_t.size + wu_t.size) * w_itemsize * 2 \
            + (bd2.size + bu2.size) * 4 * 2
        budget = max(vmem_limit_bytes - weight_bytes - (4 << 20), 1 << 20)
        per_row = 4 * D * itemsize + 4 * (Bp + D)    # 2x2 act buffers + f32 h/out
        tm = min(1024, max(8, (budget // per_row) // 8 * 8))
        tm = min(tm, max(8, _round_up(pl.cdiv(M, 4), 8)))
    tm = max(8, (tm // 8) * 8)
    tm = min(tm, _round_up(M, 8))

    grid = (pl.cdiv(M, tm),)                         # ragged tail block is masked

    out2 = pl.pallas_call(
        _adapter_kernel,
        out_shape=jax.ShapeDtypeStruct((M, D), dtype),
        grid_spec=pltpu.PrefetchScalarGridSpec(
            num_scalar_prefetch=0,
            grid=grid,
            in_specs=[
                pl.BlockSpec((tm, D), lambda i: (i, 0)),   # x tile (pipelined)
                pl.BlockSpec((D, Bp), lambda i: (0, 0)),   # W_down^T (resident)
                pl.BlockSpec((1, Bp), lambda i: (0, 0)),   # b_down
                pl.BlockSpec((Bp, D), lambda i: (0, 0)),   # W_up^T (resident)
                pl.BlockSpec((1, D), lambda i: (0, 0)),    # b_up
            ],
            out_specs=pl.BlockSpec((tm, D), lambda i: (i, 0)),
        ),
        compiler_params=pltpu.CompilerParams(
            dimension_semantics=("parallel",),
            vmem_limit_bytes=vmem_limit_bytes,
        ),
    )(x2, wd_t, bd2, wu_t, bu2)

    return out2.reshape(orig_shape)


def adapter_forward(x, w_down, b_down, w_up, b_up, *, tm=None,
                    compute_dtype=jnp.bfloat16, vmem_limit_bytes=None):
    """Adapter forward on x of shape (..., input_dim).

    compute_dtype: dtype of the matmul operands (weights + casted activations
      inside the kernel).  bf16 by default (f32 accumulation is kept; the
      residual add and output stay in x.dtype).  Pass jnp.float32 for a
      bit-accurate-to-reference path.
    """
    params = prepare_adapter_params(w_down, b_down, w_up, b_up, compute_dtype)
    return adapter_forward_prepared(x, *params, tm=tm,
                                    vmem_limit_bytes=vmem_limit_bytes)


def init_adapter_params(key, input_dim, bottleneck_dim, dtype=jnp.float32):
    """Matches the module's __init__: weights ~ N(0, 0.01); biases use the
    PyTorch Linear default U(-1/sqrt(fan_in), +1/sqrt(fan_in))."""
    k1, k2, k3, k4 = jax.random.split(key, 4)
    w_down = 0.01 * jax.random.normal(k1, (bottleneck_dim, input_dim), dtype)
    w_up = 0.01 * jax.random.normal(k2, (input_dim, bottleneck_dim), dtype)
    bd_bound = 1.0 / (input_dim ** 0.5)
    bu_bound = 1.0 / (bottleneck_dim ** 0.5)
    b_down = jax.random.uniform(k3, (bottleneck_dim,), dtype,
                                minval=-bd_bound, maxval=bd_bound)
    b_up = jax.random.uniform(k4, (input_dim,), dtype,
                              minval=-bu_bound, maxval=bu_bound)
    return w_down, b_down, w_up, b_up


def _reference(x, w_down, b_down, w_up, b_up):
    h = jnp.maximum(x @ w_down.T + b_down, 0.0)
    return h @ w_up.T + b_up + x


if __name__ == "__main__":
    key = jax.random.PRNGKey(0)
    kx, kp = jax.random.split(key)

    batch, seq, hidden, bottleneck = 2, 8, 32, 8
    x = jax.random.normal(kx, (batch, seq, hidden), jnp.float32)
    w_down, b_down, w_up, b_up = init_adapter_params(kp, hidden, bottleneck)
    ref = _reference(x, w_down, b_down, w_up, b_up)

    # 1) Default path: bf16 matmul operands, f32 accumulation/residual, output
    #    written in x.dtype directly from the kernel.
    out = adapter_forward(x, w_down, b_down, w_up, b_up)
    out = jax.block_until_ready(out)
    assert out.shape == x.shape and out.dtype == x.dtype
    assert jnp.allclose(out, ref, atol=2e-3, rtol=2e-3), "mismatch (bf16 path)"

    # 2) f32 compute path with a ragged row count and explicit small tile
    #    (exercises the masked tail block / multi-step pipelined grid).
    x_ragged = jax.random.normal(kx, (2, 7, hidden), jnp.float32)   # M = 14
    out_r = adapter_forward(x_ragged, w_down, b_down, w_up, b_up,
                            tm=8, compute_dtype=jnp.float32)
    out_r = jax.block_until_ready(out_r)
    ref_r = _reference(x_ragged, w_down, b_down, w_up, b_up)
    assert out_r.shape == x_ragged.shape
    assert jnp.allclose(out_r, ref_r, atol=1e-5, rtol=1e-5), "mismatch (f32 path)"

    print("KERNEL_OK")
</pallas_src>

<mosaic_0001>
module attributes {stable_mosaic.version = 11 : i64} {
  func.func @_adapter_kernel(%arg0: i32, %arg1: memref<8x32xf32, #tpu.memory_space<vmem>>, %arg2: memref<32x128xbf16, #tpu.memory_space<vmem>>, %arg3: memref<1x128xf32, #tpu.memory_space<vmem>>, %arg4: memref<128x32xbf16, #tpu.memory_space<vmem>>, %arg5: memref<1x32xf32, #tpu.memory_space<vmem>>, %arg6: memref<8x32xf32, #tpu.memory_space<vmem>>) attributes {dimension_semantics = [#tpu.dimension_semantics<parallel>], iteration_bounds = array<i64: 2>, scalar_prefetch = 0 : i64, scratch_operands = 0 : i64, tpu.core_type = #tpu.core_type<tc>, window_params = [{transform_indices = @transform_0, window_bounds = array<i64: 8, 32>}, {pipeline_mode = #tpu.pipeline_mode<synchronous>, transform_indices = @transform_1, window_bounds = array<i64: 32, 128>}, {pipeline_mode = #tpu.pipeline_mode<synchronous>, transform_indices = @transform_2, window_bounds = array<i64: 1, 128>}, {pipeline_mode = #tpu.pipeline_mode<synchronous>, transform_indices = @transform_3, window_bounds = array<i64: 128, 32>}, {pipeline_mode = #tpu.pipeline_mode<synchronous>, transform_indices = @transform_4, window_bounds = array<i64: 1, 32>}, {transform_indices = @transform_5, window_bounds = array<i64: 8, 32>}]} {
    %c0 = arith.constant 0 : index
    %c0_0 = arith.constant 0 : index
    %0 = vector.load %arg1[%c0, %c0_0] : memref<8x32xf32, #tpu.memory_space<vmem>>, vector<8x32xf32>
    %1 = arith.truncf %0 : vector<8x32xf32> to vector<8x32xbf16>
    %c0_1 = arith.constant 0 : index
    %c0_2 = arith.constant 0 : index
    %2 = vector.load %arg2[%c0_1, %c0_2] : memref<32x128xbf16, #tpu.memory_space<vmem>>, vector<32x128xbf16>
    %cst = arith.constant dense<0.000000e+00> : vector<8x128xf32>
    %3 = tpu.matmul %1, %2, %cst {dimension_numbers = #tpu.dot_dimension_numbers<[1], [0], [0], [1], [0, 0, 1, 1], [], []>} : vector<8x32xbf16>, vector<32x128xbf16>, vector<8x128xf32> -> vector<8x128xf32>
    %c0_3 = arith.constant 0 : index
    %c0_4 = arith.constant 0 : index
    %4 = vector.load %arg3[%c0_3, %c0_4] : memref<1x128xf32, #tpu.memory_space<vmem>>, vector<1x128xf32>
    %5 = vector.broadcast %4 : vector<1x128xf32> to vector<8x128xf32>
    %6 = arith.addf %3, %5 : vector<8x128xf32>
    %cst_5 = arith.constant 0.000000e+00 : f32
    %7 = vector.broadcast %cst_5 : f32 to vector<8x128xf32>
    %8 = arith.maximumf %6, %7 : vector<8x128xf32>
    %9 = arith.truncf %8 : vector<8x128xf32> to vector<8x128xbf16>
    %c0_6 = arith.constant 0 : index
    %c0_7 = arith.constant 0 : index
    %10 = vector.load %arg4[%c0_6, %c0_7] : memref<128x32xbf16, #tpu.memory_space<vmem>>, vector<128x32xbf16>
    %cst_8 = arith.constant dense<0.000000e+00> : vector<8x32xf32>
    %11 = tpu.matmul %9, %10, %cst_8 {dimension_numbers = #tpu.dot_dimension_numbers<[1], [0], [0], [1], [0, 0, 1, 1], [], []>} : vector<8x128xbf16>, vector<128x32xbf16>, vector<8x32xf32> -> vector<8x32xf32>
    %c0_9 = arith.constant 0 : index
    %c0_10 = arith.constant 0 : index
    %12 = vector.load %arg5[%c0_9, %c0_10] : memref<1x32xf32, #tpu.memory_space<vmem>>, vector<1x32xf32>
    %13 = vector.broadcast %12 : vector<1x32xf32> to vector<8x32xf32>
    %14 = arith.addf %11, %13 : vector<8x32xf32>
    %15 = arith.addf %14, %0 : vector<8x32xf32>
    %c0_11 = arith.constant 0 : index
    %c0_12 = arith.constant 0 : index
    %16 = vector.load %arg6[%c0_11, %c0_12] : memref<8x32xf32, #tpu.memory_space<vmem>>, vector<8x32xf32>
    tpu.vector_store %arg6[%c0_11, %c0_12], %15 {strides = array<i32>} : memref<8x32xf32, #tpu.memory_space<vmem>>, vector<8x32xf32>,
    return
  }
  func.func @transform_0(%arg0: i32) -> (i32, i32) {
    %c0_i32 = arith.constant 0 : i32
    %c0_i32_0 = arith.constant 0 : i32
    return %arg0, %c0_i32 : i32, i32
  }
  func.func @transform_1(%arg0: i32) -> (i32, i32) {
    %c0_i32 = arith.constant 0 : i32
    %c0_i32_0 = arith.constant 0 : i32
    %c0_i32_1 = arith.constant 0 : i32
    return %c0_i32, %c0_i32_0 : i32, i32
  }
  func.func @transform_2(%arg0: i32) -> (i32, i32) {
    %c0_i32 = arith.constant 0 : i32
    %c0_i32_0 = arith.constant 0 : i32
    %c0_i32_1 = arith.constant 0 : i32
    return %c0_i32, %c0_i32_0 : i32, i32
  }
  func.func @transform_3(%arg0: i32) -> (i32, i32) {
    %c0_i32 = arith.constant 0 : i32
    %c0_i32_0 = arith.constant 0 : i32
    %c0_i32_1 = arith.constant 0 : i32
    return %c0_i32, %c0_i32_0 : i32, i32
  }
  func.func @transform_4(%arg0: i32) -> (i32, i32) {
    %c0_i32 = arith.constant 0 : i32
    %c0_i32_0 = arith.constant 0 : i32
    %c0_i32_1 = arith.constant 0 : i32
    return %c0_i32, %c0_i32_0 : i32, i32
  }
  func.func @transform_5(%arg0: i32) -> (i32, i32) {
    %c0_i32 = arith.constant 0 : i32
    %c0_i32_0 = arith.constant 0 : i32
    return %arg0, %c0_i32 : i32, i32
  }
}

</mosaic_0001>

<bundles_post_ra>
// kernel: tpu_custom_call.1
= control target key start
LH: loop header
LB: loop body
LE: loop exit
PB: predicated region body
PF: predicated region fallthrough
CT: control target
= control target key end

     0   :  { %10 = vsyncpa [#allocation3], 0  ;;  %s739_s0 = inlined_call_operand.vmem [shape: f32[16,32], index: 0, kind: input, shape index: {}]   ;;  %s740_s1 = inlined_call_operand.vmem [shape: bf16[32,128], index: 1, kind: input, shape index: {}]   ;;  %s741_s2 = inlined_call_operand.vmem [shape: f32[1,128], index: 2, kind: input, shape index: {}]   ;;  %s742_s3 = inlined_call_operand.vmem [shape: bf16[128,32], index: 3, kind: input, shape index: {}]   ;;  %s743_s4 = inlined_call_operand.vmem [shape: f32[1,32], index: 4, kind: input, shape index: {}]   ;;  %s744_s5 = inlined_call_operand.hbm [shape: f32[16,32], index: 5, kind: output, shape index: {}]  }
   0x1   :  { %12 = vsyncpa [#allocation3 + $0x1], 0  ;;  %s616_s18 = smov 0   ;;  %s618_s19 = smov 0  }
   0x2   :  { %s620_s20 = smov 0   ;;  %s622_s21 = smov 0  }
   0x3 LB: > { %s637_s22 = sadd.s32 4294967295, %s584_s21   ;;  %s420_s23 = sadd.s32 4294967294, %s584_s21   ;;  %s584_s21 = sphi %s622_s21, %s750_s21   ;;  %s580_s20 = sphi %s620_s20, %s749_s20   ;;  %s576_s19 = sphi %s618_s19, %s748_s19   ;;  %s572_s18 = sphi %s616_s18, %s747_s18  }
   0x4   : > { %s641_s24 = sadd.s32 1, %s584_s21   ;;  %s135_s25 = sadd.s32 1, %s580_s20 }
   0x5   : > { %s132_s26 = ssub.s32 %s584_s21, %s641_s24  ;;  %p145_p0 = scmp.ne.s32.totalorder %s580_s20, %s576_s19 }
   0x6   : > { %p133_p1 = scmp.eq.s32.totalorder %s132_s26, 0  ;;  %p146_p2 = scmp.eq.s32.totalorder %s637_s22, 1 }
   0x7   : > { %p151_p3 = scmp.ne.s32.totalorder %s576_s19, %s572_s18  ;;  %p152_p4 = scmp.eq.s32.totalorder %s420_s23, 1 }
   0x8   : > { %s652_s27 = scalar_select %p133_p1, %s580_s20, %s135_s25  }
   0x9   : > { %p654_p5 = por %p146_p2, %p145_p0  ;;  %p658_p6 = por %p152_p4, %p151_p3 }
   0xa   : > { %p423_p7 = scmp.ge.s32.totalorder %s584_s21, 1  ;;  %p189_p8 = scmp.lt.s32.totalorder %s584_s21, 3 }
   0xc   : > { %p190_p9 = pnand %p423_p7, %p189_p8 }
   0xd   : > { %p216_p10 = scmp.lt.s32.totalorder (!%p190_p9), %s637_s22, 1  ;;  %s213_s16 = sand.u32 (!%p190_p9), 1, %s576_s19  }
   0xe   : > { %193 = sbr.rel (%p190_p9) target bundleno = 293 (0x125), region = 40  ;;  %s468_s23 = sshll.u32 (!%p190_p9), %s637_s22, 3 }
   0xf   : > { %s356_s7 = scalar_lea.hbm (!%p190_p9), %s744_s5, %s468_s23  ;;  %s542_s15 = scalar_lea.hbm (!%p190_p9), %s744_s5, 16 }
  0x10   : > { %s360_s10 = sshll.u32 (!%p190_p9), %s356_s7, 4  ;;  %s361_s10 = int_to_ptr.hbm [resolvable:$true] %s360_s10 }
  0x13   : > { %v472_v0 = vld [vmem:[%s740_s1 + $0x8] sm:$0xff]  ;;  %v480_v1 = vld [vmem:[%s742_s3 + $0x38] sm:$0xff]  ;;  %v471_v2 = vld [vmem:[%s740_s1] sm:$0xff]  ;;  %s217_s11 = scalar_select %p216_p10, %s637_s22, 1  ;;  %vm243_vm0 = vcmask 261120  }
  0x14   : > { %253 = vmatpush.bf16.msra.mxu0 %v472_v0  ;;  %330 = vmatpush.bf16.msra.mxu1 %v480_v1  ;;  %v479_v3 = vld [vmem:[%s742_s3 + $0x30] sm:$0xff]  ;;  %v478_v5 = vld [vmem:[%s742_s3 + $0x28] sm:$0xff]  ;;  %v477_v7 = vld [vmem:[%s742_s3 + $0x20] sm:$0xff]  ;;  %s346_s22 = scalar_lea.sflag [#allocation3], %s213_s16 }
  0x15   : > { %s425_s14 = sshll.u32 %s217_s11, 3  ;;  %v476_v8 = vld [vmem:[%s742_s3 + $0x18] sm:$0xff]  ;;  %v475_v9 = vld [vmem:[%s742_s3 + $0x10] sm:$0xff]  ;;  %v474_v10 = vld [vmem:[%s742_s3 + $0x8] sm:$0xff]  ;;  %s536_s11 = sshra.s32 %s361_s10, 4  ;;  %s537_s11 = int_to_ptr.hbm [resolvable:$true] %s536_s11 }
  0x16   : > { %s219_s17 = scalar_lea.vmem %s739_s0, %s425_s14  ;;  %v473_v11 = vld [vmem:[%s742_s3] sm:$0xff]  ;;  %s538_s12 = scalar_lea.hbm %s537_s11, 8 }
  0x17   : > { %v221_v4 = vld [vmem:[%s219_s17] sm:$0xff]  ;;  %s424_s17 = sshll.u32 %s213_s16, 3  ;;  %p539_p11 = scmp.ne.s32.totalorder %s537_s11, %s538_s12 }
  0x18   : > { %254 = vmatpush.bf16.msra.mxu0 %v471_v2  ;;  %331 = vmatpush.bf16.msra.mxu1 %v479_v3  ;;  %v222_v6 = vpack.c.bf16 %v221_v4, %v221_v4  ;;  %v520_v12 = vld [vmem:[%s741_s2] ss:$0 sm:$0xff]  ;;  %s215_s8 = scalar_lea.vmem [#allocation2], %s424_s17  ;;  %p543_p0 = scmp.lt.s32.totalorder %s537_s11, %s744_s5 }
  0x19   : > { %v521_v18 = vld [vmem:[%s743_s4] ss:$0 sm:$0xff]  ;;  %s358_s9 = sshll.u32 %s215_s8, 4  ;;  %p540_p12 = pnand %p539_p11, %p654_p5  ;;  %s359_s9 = int_to_ptr.vmem [resolvable:$true] %s358_s9 }
  0x1a   : > { %p544_p1 = scmp.lt.s32.totalorder %s542_s15, %s538_s12 }
  0x1b   : > { %434 = vmatmul.msk.bf16.vlgmr.msra.gmra.mxu0 %vm243_vm0, %v222_v6  ;;  %p541_p13 = pneg %p540_p12 }
  0x1c   : > { %332 = vmatpush.bf16.msra.mxu1 %v478_v5  ;;  %p545_p2 = por %p544_p1, %p543_p0 }
  0x1e   : > { %p546_p3 = pnand %p545_p2, %p541_p13 }
  0x20   : > { %333 = vmatpush.bf16.msra.mxu1 %v477_v7 }
  0x24   : > { %334 = vmatpush.bf16.msra.mxu1 %v476_v8 }
  0x28   : > { %335 = vmatpush.bf16.msra.mxu1 %v475_v9 }
  0x2c   : > { %336 = vmatpush.bf16.msra.mxu1 %v474_v10 }
  0x30   : > { %337 = vmatpush.bf16.msra.mxu1 %v473_v11 }
  0x98   : > { %v256_v13 = vpop.f32.mrf.mxu0 }
  0x99   : > { %v257_v14 = vadd.f32 %v520_v12, %v256_v13 }
  0x9b   : > { %v260_v15 = vmax.f32 %v257_v14, 0.0 }
  0x9d   : > { %v261_v16 = vpack.c.bf16 %v260_v15, %v260_v15 }
  0x9f   : > { %338 = vmatmul.bf16.vlgmr.msra.gmra.mxu1 %v261_v16 }
  0xa0   : > { %v258_v17 = vpop.f32.mrf.mxu0 }
 0x11c   : > { %v339_v19 = vpop.f32.mrf.mxu1 }
 0x11d   : > { %v340_v20 = vadd.f32 %v521_v18, %v339_v19 }
 0x11f   : > { %v343_v21 = vadd.f32 %v340_v20, %v221_v4 }
 0x121   : > { %344 = vst.msk [vmem:[%s215_s8] sm:$0xff] %vm243_vm0, %v343_v21 }
 0x122   : > { %549 = shalt.err (!%p546_p3)
}
 0x123   : > { %481 = dma.vmem_to_hbm [thread:$0]  (%p654_p5), %s359_s9, 128, %s361_s10, %s346_s22  }
 0x124   : > { %v341_v22 = vpop.f32.mrf.mxu1 }
 0x125 PF: > { %p487_p4 = scmp.ge.s32.totalorder %s584_s21, 2  ;;  %s372_s16 = sand.u32 1, %s572_s18  }
 0x126   : > { %s373_s25 = scalar_lea.sflag [#allocation3], %s372_s16 }
 0x127   : > { %p484_p7 = pnand %p487_p4, %p658_p6 }
 0x129   : > { %p485_p8 = pneg %p484_p7 }
 0x12b   : > { %567 = dma.done.wait (%p485_p8), %s373_s25, 128  }
 0x12c   : > { %569 = vsyncadd (%p485_p8), %s373_s25, 4294967168  ;;  %p15_p9 = scmp.ge.s32.totalorder %s641_s24, 4   ;;  %s747_s18 = smov %s576_s19 }
 0x12d   : > { %s748_s19 = smov %s580_s20  ;;  %s749_s20 = smov %s652_s27 }
 0x12e   : > { %s750_s21 = smov %s641_s24  ;;  %17 = sbr.rel (!%p15_p9) target bundleno = 3 (0x3), region = 75 }
 0x133   :  { %379 = vsyncpa [#allocation3], 1 }
 0x134   :  { %381 = vsyncpa [#allocation3 + $0x1], 1 }

</bundles_post_ra>
